<compile_context>
chip_gen: v7x
topology: tpu7x:2x2x1
jax: 0.10.0
libtpu: 0.0.40
codegen_flags: <defaults>
</compile_context>

<pallas_src>
import functools

import jax
import jax.numpy as jnp
from jax import lax
from jax.experimental import pallas as pl
from jax.experimental.pallas import tpu as pltpu

BN_EPS = 1e-5
_NEG_LARGE = -3.0e38  # finite "minus infinity" for the masked max pool
_VMEM = pl.BlockSpec(memory_space=pltpu.MemorySpace.VMEM)


def _bn_normalize(x, s1, s2, count):
    """Training-mode BatchNorm1d (gamma=1, beta=0) given precomputed sum / sum-of-squares."""
    inv_n = 1.0 / float(count)
    mean = s1 * inv_n
    var = jnp.maximum(s2 * inv_n - mean * mean, 0.0)   # clamp: single-pass var can go <0
    return (x - mean) * lax.rsqrt(var + BN_EPS)


def _sign_fused_kernel(x_ref, wblk_ref, bblk_ref,
                       w1_ref, b1_ref, w2_ref, b2_ref, w3_ref, b3_ref,
                       o_ref, *, n_graphs, n_nodes, n_pad):
    feat = wblk_ref.shape[1]            # F = k * hidden
    n_valid = n_graphs * n_nodes        # real (non-padded) node rows

    # 1) All k SIGN branch Linears as ONE lane-dense matmul (block-diag packed weights).
    #    bf16 operands, f32 accumulation on the MXU.
    h = jnp.dot(x_ref[...], wblk_ref[...],
                preferred_element_type=jnp.float32) + bblk_ref[...]

    # Sublane-aligned node-major view: n_pad % 8 == 0, so this reshape is layout-clean.
    h3 = h.reshape(n_graphs, n_pad, feat)
    node_idx = lax.broadcasted_iota(jnp.int32, (n_graphs, n_pad, 1), 1)
    valid = node_idx < n_nodes                          # padded rows are excluded everywhere

    # 2) bn_hidden_rec over the B*N valid node rows (single masked pass, f32 stats).
    hm = jnp.where(valid, h3, 0.0)
    s1 = jnp.sum(hm, axis=(0, 1), keepdims=True)
    s2 = jnp.sum(hm * hm, axis=(0, 1), keepdims=True)
    h3 = _bn_normalize(h3, s1, s2, n_valid)

    # 3) Per-graph mean / add / max pooling: single aligned reductions over axis=1
    #    (no per-graph loop, no scratch, no lane-sparse stores).
    g_add = jnp.sum(jnp.where(valid, h3, 0.0), axis=1)          # (B, F)
    g_max = jnp.max(jnp.where(valid, h3, _NEG_LARGE), axis=1)   # (B, F)
    p = jnp.concatenate([g_add * (1.0 / float(n_nodes)),        # mean pool
                         g_add,                                  # add  pool
                         g_max], axis=1)                         # max  pool  -> (B, 3F)

    # 4) bn_out over the B graph rows (single-pass stats, f32).
    s1p = jnp.sum(p, axis=0, keepdims=True)
    s2p = jnp.sum(p * p, axis=0, keepdims=True)
    p = _bn_normalize(p, s1p, s2p, n_graphs)

    # 5) Funnel readout: relu(lin1) -> dropout(id) -> relu(lin2) -> dropout(id)
    #    -> log_softmax(lin3). bf16 matmul operands, f32 accumulation.
    p = p.astype(w1_ref.dtype)
    z1 = jnp.dot(p, w1_ref[...], preferred_element_type=jnp.float32) + b1_ref[...]
    z1 = jnp.maximum(z1, 0.0).astype(w2_ref.dtype)
    z2 = jnp.dot(z1, w2_ref[...], preferred_element_type=jnp.float32) + b2_ref[...]
    z2 = jnp.maximum(z2, 0.0).astype(w3_ref.dtype)
    logits = jnp.dot(z2, w3_ref[...], preferred_element_type=jnp.float32) + b3_ref[...]

    m = jnp.max(logits, axis=1, keepdims=True)
    s = logits - m
    lse = jnp.log(jnp.sum(jnp.exp(s), axis=1, keepdims=True))
    o_ref[...] = (s - lse).astype(o_ref.dtype)


def init_params(key, in_channels, hidden, n_class, k):
    def lin(kk, fin, fout):
        kw, kb = jax.random.split(kk)
        bound = 1.0 / float(fin) ** 0.5          # PyTorch nn.Linear default range
        w = jax.random.uniform(kw, (fin, fout), jnp.float32, -bound, bound)
        b = jax.random.uniform(kb, (1, fout), jnp.float32, -bound, bound)
        return w, b

    keys = jax.random.split(key, k + 3)
    lins = [lin(keys[i], in_channels, hidden) for i in range(k)]
    feat = k * hidden
    return {
        "lins": lins,                                  # SIGN per-hop linears
        "lin1": lin(keys[k], 3 * feat, 2 * feat),
        "lin2": lin(keys[k + 1], 2 * feat, feat),
        "lin3": lin(keys[k + 2], feat, n_class),
    }


def sign_net_forward(xs, params, n_nodes):
    """xs: list of k arrays (B*N, Cin) -- the precomputed data.x, data.x1, ..., data.x{k-1}."""
    k = len(xs)
    bn_rows, cin = xs[0].shape
    n_graphs = bn_rows // n_nodes
    n_pad = ((n_nodes + 7) // 8) * 8               # 100 -> 104: sublane-aligned graphs
    hidden = params["lins"][0][0].shape[1]
    feat = k * hidden
    n_class = params["lin3"][0].shape[1]

    # Pad each graph to n_pad node rows (zeros; excluded in-kernel from BN stats & pooling)
    # and pack the k branch Linears into one block-diagonal weight:
    #   concat_i(x_i @ W_i + b_i) == [x_0 | ... | x_{k-1}] @ blockdiag(W_i) + [b_0 | ... | b_{k-1}]
    def pad_nodes(a):
        a3 = a.reshape(n_graphs, n_nodes, -1)
        a3 = jnp.pad(a3, ((0, 0), (0, n_pad - n_nodes), (0, 0)))
        return a3.reshape(n_graphs * n_pad, -1)

    x_all = jnp.concatenate([pad_nodes(a) for a in xs], axis=1)                # (B*Npad, k*Cin)
    w_blk = jax.scipy.linalg.block_diag(*[w for (w, _) in params["lins"]])     # (k*Cin, k*H)
    b_blk = jnp.concatenate([b for (_, b) in params["lins"]], axis=1)          # (1, k*H)

    w1, b1 = params["lin1"]
    w2, b2 = params["lin2"]
    w3, b3 = params["lin3"]

    # bf16 matmul operands (halved DMA bytes); biases / BN / softmax stay in f32.
    # NOTE: block-diag packing is only used while k*cin fits one MXU K tile (it does here).
    x_all = x_all.astype(jnp.bfloat16)
    w_blk = w_blk.astype(jnp.bfloat16)
    w1b, w2b, w3b = (w.astype(jnp.bfloat16) for w in (w1, w2, w3))

    rows = n_graphs * n_pad
    flops = 2 * (rows * (k * cin) * feat
                 + n_graphs * (3 * feat * 2 * feat + 2 * feat * feat + feat * n_class))
    bytes_accessed = (x_all.size * 2 + w_blk.size * 2 + b_blk.size * 4
                      + w1b.size * 2 + b1.size * 4 + w2b.size * 2 + b2.size * 4
                      + w3b.size * 2 + b3.size * 4 + n_graphs * n_class * 4)

    kernel = functools.partial(_sign_fused_kernel,
                               n_graphs=n_graphs, n_nodes=n_nodes, n_pad=n_pad)
    return pl.pallas_call(
        kernel,
        out_shape=jax.ShapeDtypeStruct((n_graphs, n_class), jnp.float32),
        in_specs=[_VMEM] * 9,
        out_specs=_VMEM,
        compiler_params=pltpu.CompilerParams(vmem_limit_bytes=32 * 1024 * 1024),
        cost_estimate=pl.CostEstimate(
            flops=flops,
            transcendentals=n_graphs * n_class + 4 * feat,
            bytes_accessed=bytes_accessed),
    )(x_all, w_blk, b_blk, w1b, b1, w2b, b2, w3b, b3)


if __name__ == "__main__":
    key = jax.random.PRNGKey(0)
    k_x, k_p = jax.random.split(key)

    batch, n_nodes = 2, 100                      # GC_net.py hard-codes 100 nodes / graph
    in_channels, hidden, n_class, k_hops = 1, 8, 4, 2

    # Raw node features for each graph.
    x0 = jax.random.normal(k_x, (batch, n_nodes, in_channels), jnp.float32)

    # Deterministic symmetric-normalized ring graph (with self loops). Used ONLY for the
    # SIGN data preprocessing that builds data.x, data.x1, ... — not part of the model.
    idx = jnp.arange(n_nodes)
    A = (jnp.zeros((n_nodes, n_nodes), jnp.float32)
         .at[idx, (idx + 1) % n_nodes].set(1.0)
         .at[idx, (idx - 1) % n_nodes].set(1.0)
         .at[idx, idx].set(1.0))
    d_inv_sqrt = 1.0 / jnp.sqrt(jnp.sum(A, axis=1))
    L = A * d_inv_sqrt[:, None] * d_inv_sqrt[None, :]

    # SIGN precomputation: x_i = L @ x_{i-1}, per graph (plain-JAX preprocessing).
    xs = [x0]
    for _ in range(1, k_hops):
        xs.append(jnp.einsum('nm,bmc->bnc', L, xs[-1]))
    xs = [a.reshape(batch * n_nodes, in_channels) for a in xs]

    params = init_params(k_p, in_channels, hidden, n_class, k_hops)

    out = sign_net_forward(xs, params, n_nodes=n_nodes)
    jax.block_until_ready(out)
    assert out.shape == (batch, n_class)
    print("KERNEL_OK")
</pallas_src>

<mosaic_0001>
module attributes {stable_mosaic.version = 11 : i64} {
  func.func @_sign_fused_kernel(%arg0: memref<208x2xbf16, #tpu.memory_space<vmem>>, %arg1: memref<2x16xbf16, #tpu.memory_space<vmem>>, %arg2: memref<1x16xf32, #tpu.memory_space<vmem>>, %arg3: memref<48x32xbf16, #tpu.memory_space<vmem>>, %arg4: memref<1x32xf32, #tpu.memory_space<vmem>>, %arg5: memref<32x16xbf16, #tpu.memory_space<vmem>>, %arg6: memref<1x16xf32, #tpu.memory_space<vmem>>, %arg7: memref<16x4xbf16, #tpu.memory_space<vmem>>, %arg8: memref<1x4xf32, #tpu.memory_space<vmem>>, %arg9: memref<2x4xf32, #tpu.memory_space<vmem>>) attributes {dimension_semantics = [], scalar_prefetch = 0 : i64, scratch_operands = 0 : i64, tpu.core_type = #tpu.core_type<tc>} {
    %c0 = arith.constant 0 : index
    %c0_0 = arith.constant 0 : index
    %0 = vector.load %arg0[%c0, %c0_0] : memref<208x2xbf16, #tpu.memory_space<vmem>>, vector<208x2xbf16>
    %c0_1 = arith.constant 0 : index
    %c0_2 = arith.constant 0 : index
    %1 = vector.load %arg1[%c0_1, %c0_2] : memref<2x16xbf16, #tpu.memory_space<vmem>>, vector<2x16xbf16>
    %cst = arith.constant dense<0.000000e+00> : vector<208x16xf32>
    %2 = tpu.matmul %0, %1, %cst {dimension_numbers = #tpu.dot_dimension_numbers<[1], [0], [0], [1], [0, 0, 1, 1], [], []>} : vector<208x2xbf16>, vector<2x16xbf16>, vector<208x16xf32> -> vector<208x16xf32>
    %c0_3 = arith.constant 0 : index
    %c0_4 = arith.constant 0 : index
    %3 = vector.load %arg2[%c0_3, %c0_4] : memref<1x16xf32, #tpu.memory_space<vmem>>, vector<1x16xf32>
    %4 = vector.broadcast %3 : vector<1x16xf32> to vector<208x16xf32>
    %5 = arith.addf %2, %4 : vector<208x16xf32>
    %6 = vector.shape_cast %5 : vector<208x16xf32> to vector<2x104x16xf32>
    %7 = tpu.iota {dimensions = array<i32: 1>} : vector<2x104x1xi32>
    %c100_i32 = arith.constant 100 : i32
    %8 = vector.broadcast %c100_i32 : i32 to vector<2x104x1xi32>
    %9 = arith.cmpi slt, %7, %8 : vector<2x104x1xi32>
    %cst_5 = arith.constant 0.000000e+00 : f32
    %10 = vector.shape_cast %9 : vector<2x104x1xi1> to vector<2x104x1xi1>
    %11 = vector.broadcast %10 : vector<2x104x1xi1> to vector<2x104x16xi1>
    %12 = vector.broadcast %cst_5 : f32 to vector<2x104x16xf32>
    %13 = arith.select %11, %6, %12 : vector<2x104x16xi1>, vector<2x104x16xf32>
    %cst_6 = arith.constant dense<0.000000e+00> : vector<16xf32>
    %14 = vector.multi_reduction <add>, %13, %cst_6 [0, 1] : vector<2x104x16xf32> to vector<16xf32>
    %15 = vector.shape_cast %14 : vector<16xf32> to vector<1x1x16xf32>
    %16 = arith.mulf %13, %13 : vector<2x104x16xf32>
    %cst_7 = arith.constant dense<0.000000e+00> : vector<16xf32>
    %17 = vector.multi_reduction <add>, %16, %cst_7 [0, 1] : vector<2x104x16xf32> to vector<16xf32>
    %18 = vector.shape_cast %17 : vector<16xf32> to vector<1x1x16xf32>
    %cst_8 = arith.constant 5.000000e-03 : f32
    %19 = vector.broadcast %cst_8 : f32 to vector<1x1x16xf32>
    %20 = arith.mulf %15, %19 : vector<1x1x16xf32>
    %cst_9 = arith.constant 5.000000e-03 : f32
    %21 = vector.broadcast %cst_9 : f32 to vector<1x1x16xf32>
    %22 = arith.mulf %18, %21 : vector<1x1x16xf32>
    %23 = arith.mulf %20, %20 : vector<1x1x16xf32>
    %24 = arith.subf %22, %23 : vector<1x1x16xf32>
    %cst_10 = arith.constant 0.000000e+00 : f32
    %25 = vector.broadcast %cst_10 : f32 to vector<1x1x16xf32>
    %26 = arith.maximumf %24, %25 : vector<1x1x16xf32>
    %27 = vector.broadcast %20 : vector<1x1x16xf32> to vector<2x104x16xf32>
    %28 = arith.subf %6, %27 : vector<2x104x16xf32>
    %cst_11 = arith.constant 9.99999974E-6 : f32
    %29 = vector.broadcast %cst_11 : f32 to vector<1x1x16xf32>
    %30 = arith.addf %26, %29 : vector<1x1x16xf32>
    %31 = math.rsqrt %30 : vector<1x1x16xf32>
    %32 = vector.broadcast %31 : vector<1x1x16xf32> to vector<2x104x16xf32>
    %33 = arith.mulf %28, %32 : vector<2x104x16xf32>
    %cst_12 = arith.constant 0.000000e+00 : f32
    %34 = vector.shape_cast %9 : vector<2x104x1xi1> to vector<2x104x1xi1>
    %35 = vector.broadcast %34 : vector<2x104x1xi1> to vector<2x104x16xi1>
    %36 = vector.broadcast %cst_12 : f32 to vector<2x104x16xf32>
    %37 = arith.select %35, %33, %36 : vector<2x104x16xi1>, vector<2x104x16xf32>
    %cst_13 = arith.constant dense<0.000000e+00> : vector<2x16xf32>
    %38 = vector.multi_reduction <add>, %37, %cst_13 [1] : vector<2x104x16xf32> to vector<2x16xf32>
    %cst_14 = arith.constant -3.000000e+38 : f32
    %39 = vector.shape_cast %9 : vector<2x104x1xi1> to vector<2x104x1xi1>
    %40 = vector.broadcast %39 : vector<2x104x1xi1> to vector<2x104x16xi1>
    %41 = vector.broadcast %cst_14 : f32 to vector<2x104x16xf32>
    %42 = arith.select %40, %33, %41 : vector<2x104x16xi1>, vector<2x104x16xf32>
    %cst_15 = arith.constant dense<0xFF800000> : vector<2x16xf32>
    %43 = vector.multi_reduction <maximumf>, %42, %cst_15 [1] : vector<2x104x16xf32> to vector<2x16xf32>
    %cst_16 = arith.constant 0.00999999977 : f32
    %44 = vector.broadcast %cst_16 : f32 to vector<2x16xf32>
    %45 = arith.mulf %38, %44 : vector<2x16xf32>
    %46 = tpu.concatenate %45, %38, %43 in 1 : vector<2x16xf32>, vector<2x16xf32>, vector<2x16xf32> -> vector<2x48xf32>
    %cst_17 = arith.constant dense<0.000000e+00> : vector<48xf32>
    %47 = vector.multi_reduction <add>, %46, %cst_17 [0] : vector<2x48xf32> to vector<48xf32>
    %48 = vector.shape_cast %47 : vector<48xf32> to vector<1x48xf32>
    %49 = arith.mulf %46, %46 : vector<2x48xf32>
    %cst_18 = arith.constant dense<0.000000e+00> : vector<48xf32>
    %50 = vector.multi_reduction <add>, %49, %cst_18 [0] : vector<2x48xf32> to vector<48xf32>
    %51 = vector.shape_cast %50 : vector<48xf32> to vector<1x48xf32>
    %cst_19 = arith.constant 5.000000e-01 : f32
    %52 = vector.broadcast %cst_19 : f32 to vector<1x48xf32>
    %53 = arith.mulf %48, %52 : vector<1x48xf32>
    %cst_20 = arith.constant 5.000000e-01 : f32
    %54 = vector.broadcast %cst_20 : f32 to vector<1x48xf32>
    %55 = arith.mulf %51, %54 : vector<1x48xf32>
    %56 = arith.mulf %53, %53 : vector<1x48xf32>
    %57 = arith.subf %55, %56 : vector<1x48xf32>
    %cst_21 = arith.constant 0.000000e+00 : f32
    %58 = vector.broadcast %cst_21 : f32 to vector<1x48xf32>
    %59 = arith.maximumf %57, %58 : vector<1x48xf32>
    %60 = vector.broadcast %53 : vector<1x48xf32> to vector<2x48xf32>
    %61 = arith.subf %46, %60 : vector<2x48xf32>
    %cst_22 = arith.constant 9.99999974E-6 : f32
    %62 = vector.broadcast %cst_22 : f32 to vector<1x48xf32>
    %63 = arith.addf %59, %62 : vector<1x48xf32>
    %64 = math.rsqrt %63 : vector<1x48xf32>
    %65 = vector.broadcast %64 : vector<1x48xf32> to vector<2x48xf32>
    %66 = arith.mulf %61, %65 : vector<2x48xf32>
    %67 = arith.truncf %66 : vector<2x48xf32> to vector<2x48xbf16>
    %c0_23 = arith.constant 0 : index
    %c0_24 = arith.constant 0 : index
    %68 = vector.load %arg3[%c0_23, %c0_24] : memref<48x32xbf16, #tpu.memory_space<vmem>>, vector<48x32xbf16>
    %cst_25 = arith.constant dense<0.000000e+00> : vector<2x32xf32>
    %69 = tpu.matmul %67, %68, %cst_25 {dimension_numbers = #tpu.dot_dimension_numbers<[1], [0], [0], [1], [0, 0, 1, 1], [], []>} : vector<2x48xbf16>, vector<48x32xbf16>, vector<2x32xf32> -> vector<2x32xf32>
    %c0_26 = arith.constant 0 : index
    %c0_27 = arith.constant 0 : index
    %70 = vector.load %arg4[%c0_26, %c0_27] : memref<1x32xf32, #tpu.memory_space<vmem>>, vector<1x32xf32>
    %71 = vector.broadcast %70 : vector<1x32xf32> to vector<2x32xf32>
    %72 = arith.addf %69, %71 : vector<2x32xf32>
    %cst_28 = arith.constant 0.000000e+00 : f32
    %73 = vector.broadcast %cst_28 : f32 to vector<2x32xf32>
    %74 = arith.maximumf %72, %73 : vector<2x32xf32>
    %75 = arith.truncf %74 : vector<2x32xf32> to vector<2x32xbf16>
    %c0_29 = arith.constant 0 : index
    %c0_30 = arith.constant 0 : index
    %76 = vector.load %arg5[%c0_29, %c0_30] : memref<32x16xbf16, #tpu.memory_space<vmem>>, vector<32x16xbf16>
    %cst_31 = arith.constant dense<0.000000e+00> : vector<2x16xf32>
    %77 = tpu.matmul %75, %76, %cst_31 {dimension_numbers = #tpu.dot_dimension_numbers<[1], [0], [0], [1], [0, 0, 1, 1], [], []>} : vector<2x32xbf16>, vector<32x16xbf16>, vector<2x16xf32> -> vector<2x16xf32>
    %c0_32 = arith.constant 0 : index
    %c0_33 = arith.constant 0 : index
    %78 = vector.load %arg6[%c0_32, %c0_33] : memref<1x16xf32, #tpu.memory_space<vmem>>, vector<1x16xf32>
    %79 = vector.broadcast %78 : vector<1x16xf32> to vector<2x16xf32>
    %80 = arith.addf %77, %79 : vector<2x16xf32>
    %cst_34 = arith.constant 0.000000e+00 : f32
    %81 = vector.broadcast %cst_34 : f32 to vector<2x16xf32>
    %82 = arith.maximumf %80, %81 : vector<2x16xf32>
    %83 = arith.truncf %82 : vector<2x16xf32> to vector<2x16xbf16>
    %c0_35 = arith.constant 0 : index
    %c0_36 = arith.constant 0 : index
    %84 = vector.load %arg7[%c0_35, %c0_36] : memref<16x4xbf16, #tpu.memory_space<vmem>>, vector<16x4xbf16>
    %cst_37 = arith.constant dense<0.000000e+00> : vector<2x4xf32>
    %85 = tpu.matmul %83, %84, %cst_37 {dimension_numbers = #tpu.dot_dimension_numbers<[1], [0], [0], [1], [0, 0, 1, 1], [], []>} : vector<2x16xbf16>, vector<16x4xbf16>, vector<2x4xf32> -> vector<2x4xf32>
    %c0_38 = arith.constant 0 : index
    %c0_39 = arith.constant 0 : index
    %86 = vector.load %arg8[%c0_38, %c0_39] : memref<1x4xf32, #tpu.memory_space<vmem>>, vector<1x4xf32>
    %87 = vector.broadcast %86 : vector<1x4xf32> to vector<2x4xf32>
    %88 = arith.addf %85, %87 : vector<2x4xf32>
    %cst_40 = arith.constant dense<0xFF800000> : vector<2xf32>
    %89 = vector.multi_reduction <maximumf>, %88, %cst_40 [1] : vector<2x4xf32> to vector<2xf32>
    %90 = vector.shape_cast %89 : vector<2xf32> to vector<2x1xf32>
    %91 = vector.broadcast %90 : vector<2x1xf32> to vector<2x4xf32>
    %92 = arith.subf %88, %91 : vector<2x4xf32>
    %93 = math.exp %92 : vector<2x4xf32>
    %cst_41 = arith.constant dense<0.000000e+00> : vector<2xf32>
    %94 = vector.multi_reduction <add>, %93, %cst_41 [1] : vector<2x4xf32> to vector<2xf32>
    %95 = vector.shape_cast %94 : vector<2xf32> to vector<2x1xf32>
    %96 = math.log %95 : vector<2x1xf32>
    %97 = vector.broadcast %96 : vector<2x1xf32> to vector<2x4xf32>
    %98 = arith.subf %92, %97 : vector<2x4xf32>
    %c0_42 = arith.constant 0 : index
    %c0_43 = arith.constant 0 : index
    %99 = vector.load %arg9[%c0_42, %c0_43] : memref<2x4xf32, #tpu.memory_space<vmem>>, vector<2x4xf32>
    tpu.vector_store %arg9[%c0_42, %c0_43], %98 {strides = array<i32>} : memref<2x4xf32, #tpu.memory_space<vmem>>, vector<2x4xf32>,
    return
  }
}

</mosaic_0001>

<bundles_post_ra>
// kernel: tpu_custom_call.1
= control target key start
LH: loop header
LB: loop body
LE: loop exit
PB: predicated region body
PF: predicated region fallthrough
CT: control target
= control target key end

     0   :  { %vm173_vm0 = vcmask 1040384   ;;  %v1246_v1 = vmov 0.0   ;;  %vm1247_vm1 = vmmov 0   ;;  %vm133_vm2 = vcmask 15360   ;;  %s1873_s0 = inlined_call_operand.vmem [shape: bf16[208,2], index: 0, kind: input, shape index: {}]   ;;  %s1874_s1 = inlined_call_operand.vmem [shape: bf16[2,16], index: 1, kind: input, shape index: {}]   ;;  %s1875_s2 = inlined_call_operand.vmem [shape: f32[1,16], index: 2, kind: input, shape index: {}]   ;;  %s1876_s3 = inlined_call_operand.vmem [shape: bf16[48,32], index: 3, kind: input, shape index: {}]   ;;  %s1877_s4 = inlined_call_operand.vmem [shape: f32[1,32], index: 4, kind: input, shape index: {}]   ;;  %s1878_s5 = inlined_call_operand.vmem [shape: bf16[32,16], index: 5, kind: input, shape index: {}]   ;;  %s1879_s6 = inlined_call_operand.vmem [shape: f32[1,16], index: 6, kind: input, shape index: {}]   ;;  %s1880_s7 = inlined_call_operand.vmem [shape: bf16[16,4], index: 7, kind: input, shape index: {}]   ;;  %s1881_s8 = inlined_call_operand.vmem [shape: f32[1,4], index: 8, kind: input, shape index: {}]   ;;  %s1882_s9 = inlined_call_operand.hbm [shape: f32[2,4], index: 9, kind: output, shape index: {}]  }
   0x1   :  { %v60_v0 = vld [vmem:[%s1874_s1] sm:$0x1]  ;;  %1110 = vmatprep.subr.bf16.mxu0 %v1246_v1  ;;  %1112 = vmatprep.mubr.msk.bf16.mxu0 %vm1247_vm1, %v1246_v1  ;;  %v1196_v5 = vld [vmem:[%s1873_s0 + $0x8] sm:$0xff]   ;;  %v1197_v7 = vld [vmem:[%s1873_s0 + $0x10] sm:$0xff]  }
   0x2   :  { %v175_v2 = vsel %vm173_vm0, %v60_v0, 0  ;;  %v1195_v3 = vld [vmem:[%s1873_s0] sm:$0xff]   ;;  %1188 = vmatprep.subr.bf16.mxu1 %v1246_v1  ;;  %1144 = vmatprep.mubr.msk.bf16.mxu1 %vm1247_vm1, %v1246_v1  ;;  %v1203_v6 = vld [vmem:[%s1873_s0 + $0x48] sm:$0xff]  }
   0x3   :  { %1111 = vmatpush3.bf16.msra.mxu0 %v175_v2  ;;  %1189 = vmatpush3.bf16.msra.mxu1 %v175_v2  ;;  %v1201_v4 = vld [vmem:[%s1873_s0 + $0x40] sm:$0xff]  }
   0x4   :  { %1164 = vmatprep.subr.bf16.mxu1 %v1246_v1 }
   0x6   :  { %1113 = vmatmul.mubr.msk.bf16.vlgmr.msra.gmra.mrb[0].mxu0 %vm133_vm2, %v1195_v3  ;;  %1145 = vmatmul.mubr.msk.bf16.vlgmr.msra.gmra.mrb[0].mxu1 %vm133_vm2, %v1201_v4 }
   0x7   :  { %1116 = vmatprep.mubr.msk.bf16.mxu0 %vm1247_vm1, %v1246_v1  ;;  %1148 = vmatprep.mubr.msk.bf16.mxu1 %vm1247_vm1, %v1246_v1 }
   0xe   :  { %1117 = vmatmul.mubr.msk.bf16.gmra.mrb[4].mxu0 %vm133_vm2, %v1196_v5  ;;  %1149 = vmatmul.mubr.msk.bf16.gmra.mrb[4].mxu1 %vm133_vm2, %v1203_v6 }
   0xf   :  { %1120 = vmatprep.mubr.msk.bf16.mxu0 %vm1247_vm1, %v1246_v1  ;;  %1152 = vmatprep.mubr.msk.bf16.mxu1 %vm1247_vm1, %v1246_v1 }
  0x10   :  { %14 = vsyncpa [#allocation3], 0  ;;  %v1205_v8 = vld [vmem:[%s1873_s0 + $0x50] sm:$0xff]   ;;  %v1198_v9 = vld [vmem:[%s1873_s0 + $0x18] sm:$0xff]   ;;  %vm393_vm3 = vcmask 130048   ;;  %vm773_vm5 = vcmask 1041409  }
  0x11   :  { %v1206_v10 = vld [vmem:[%s1873_s0 + $0x58] sm:$0xff]   ;;  %v1199_v11 = vld [vmem:[%s1873_s0 + $0x20] sm:$0xff]   ;;  %v1200_v13 = vld [vmem:[%s1873_s0 + $0x28] sm:$0xff]   ;;  %s1248_s16 = smov 16   ;;  %s1249_s17 = smov 32   ;;  %vm789_vm6 = vcmask 261120  }
  0x12   :  { %v1207_v12 = vld [vmem:[%s1873_s0 + $0x60] sm:$0xff]   ;;  %v1202_v14 = vld [vmem:[%s1873_s0 + $0x30] sm:$0xff]   ;;  %v1204_v15 = vld [vmem:[%s1873_s0 + $0x38] sm:$0xff]   ;;  %vm791_vm7 = vcmask 386048   ;;  %vm848_vm8 = vcmask 392192   ;;  %vm1020_vm9 = vcmask 25600  }
  0x13   :  { %v1394_v24 = vld [vmem:[%s1875_s2] ss:$0 sm:$0xff] }
  0x16   :  { %1121 = vmatmul.mubr.msk.bf16.gmra.mrb[8].mxu0 %vm133_vm2, %v1197_v7  ;;  %1153 = vmatmul.mubr.msk.bf16.gmra.mrb[8].mxu1 %vm133_vm2, %v1205_v8 }
  0x17   :  { %1124 = vmatprep.mubr.msk.bf16.mxu0 %vm1247_vm1, %v1246_v1  ;;  %1156 = vmatprep.mubr.msk.bf16.mxu1 %vm1247_vm1, %v1246_v1 }
  0x1e   :  { %1125 = vmatmul.mubr.msk.bf16.gmra.mrb[12].mxu0 %vm133_vm2, %v1198_v9  ;;  %1157 = vmatmul.mubr.msk.bf16.gmra.mrb[12].mxu1 %vm133_vm2, %v1206_v10 }
  0x1f   :  { %1128 = vmatprep.mubr.msk.bf16.mxu0 %vm1247_vm1, %v1246_v1  ;;  %1160 = vmatprep.mubr.msk.bf16.mxu1 %vm1247_vm1, %v1246_v1 }
  0x26   :  { %1129 = vmatmul.mubr.msk.bf16.gmra.mrb[16].mxu0 %vm133_vm2, %v1199_v11  ;;  %1161 = vmatmul.mubr.msk.bf16.gmra.mrb[16].mxu1 %vm133_vm2, %v1207_v12 }
  0x27   :  { %1132 = vmatprep.mubr.msk.bf16.mxu0 %vm1247_vm1, %v1246_v1  ;;  %1170 = vmatprep.mubr.msk.bf16.mxu1 %vm1247_vm1, %v1246_v1 }
  0x2e   :  { %1133 = vmatmul.mubr.msk.bf16.gmra.mrb[20].mxu0 %vm133_vm2, %v1200_v13 }
  0x2f   :  { %1136 = vmatprep.mubr.msk.bf16.mxu0 %vm1247_vm1, %v1246_v1 }
  0x36   :  { %1137 = vmatmul.mubr.msk.bf16.gmra.mrb[24].mxu0 %vm133_vm2, %v1202_v14 }
  0x37   :  { %1140 = vmatprep.mubr.msk.bf16.mxu0 %vm1247_vm1, %v1246_v1 }
  0x3e   :  { %1141 = vmatmul.mubr.msk.bf16.gmra.mrb[28].mxu0 %vm133_vm2, %v1204_v15 }
  0xd9   :  { %v211_v16 = vpop.f32.mrb[0].mxu0  ;;  %v1387_v20 = vpop.f32.mrb[0].mxu1 }
  0xda   :  { %v1114_v17 = vpop.f32.mrb[1].mxu0  ;;  %v1146_v21 = vpop.f32.mrb[1].mxu1  ;;  %v1400_v29 = vadd.f32 %v1394_v24, %v211_v16 }
  0xdb   :  { %v214_v18 = vpop.f32.mrb[2].mxu0  ;;  %v1389_v22 = vpop.f32.mrb[2].mxu1 }
  0xdc   :  { %v1115_v19 = vpop.f32.mrb[3].mxu0  ;;  %v1147_v23 = vpop.f32.mrb[3].mxu1  ;;  %v1397_v26 = vadd.f32 %v1394_v24, %v214_v18  ;;  %v451_v36 = vmul.f32 %v1400_v29, %v1400_v29  ;;  %v394_v42 = vsel %vm393_vm3, %v1400_v29, 0.0 }
  0xde   :  { %v452_v33 = vmul.f32 %v1397_v26, %v1397_v26  ;;  %v395_v37 = vsel %vm393_vm3, %v1397_v26, 0.0  ;;  %v477_v49 = vsel %vm393_vm3, %v451_v36, 0.0 }
  0xdf   :  { %v396_v47 = vadd.f32 %v395_v37, %v394_v42 }
  0xe0   :  { %v478_v43 = vsel %vm393_vm3, %v452_v33, 0.0 }
  0xe1   :  { %v219_v25 = vpop.f32.mrb[4].mxu0  ;;  %v1405_v32 = vpop.f32.mrb[4].mxu1  ;;  %v479_v53 = vadd.f32 %v478_v43, %v477_v49  ;;  %v314_v49 = vlaneseq }
  0xe2   :  { %v1118_v27 = vpop.f32.mrb[5].mxu0  ;;  %v1403_v30 = vadd.f32 %v1394_v24, %v219_v25  ;;  %v1150_v34 = vpop.f32.mrb[5].mxu1 }
  0xe3   :  { %v222_v28 = vpop.f32.mrb[6].mxu0  ;;  %v1409_v35 = vpop.f32.mrb[6].mxu1 }
  0xe4   :  { %v1119_v31 = vpop.f32.mrb[7].mxu0  ;;  %v453_v38 = vmul.f32 %v1403_v30, %v1403_v30  ;;  %v1418_v39 = vadd.f32 %v1394_v24, %v222_v28  ;;  %v1151_v40 = vpop.f32.mrb[7].mxu1  ;;  %v397_v44 = vsel %vm393_vm3, %v1403_v30, 0.0 }
  0xe5   :  { %v398_v54 = vadd.f32 %v397_v44, %v396_v47 }
  0xe6   :  { %v480_v50 = vsel %vm393_vm3, %v453_v38, 0.0  ;;  %v454_v51 = vmul.f32 %v1418_v39, %v1418_v39  ;;  %v399_v56 = vsel %vm393_vm3, %v1418_v39, 0.0 }
  0xe7   :  { %v481_v60 = vadd.f32 %v480_v50, %v479_v53  ;;  %v400_v2 = vadd.f32 %v399_v56, %v398_v54 }
  0xe8   :  { %v482_v62 = vsel %vm393_vm3, %v454_v51, 0.0 }
  0xe9   :  { %v227_v41 = vpop.f32.mrb[8].mxu0  ;;  %v1432_v55 = vpop.f32.mrb[8].mxu1  ;;  %v483_v8 = vadd.f32 %v482_v62, %v481_v60 }
  0xea   :  { %v1426_v45 = vadd.f32 %v1394_v24, %v227_v41  ;;  %v1122_v46 = vpop.f32.mrb[9].mxu0  ;;  %v1154_v59 = vpop.f32.mrb[9].mxu1 }
  0xeb   :  { %v230_v48 = vpop.f32.mrb[10].mxu0  ;;  %v1441_v61 = vpop.f32.mrb[10].mxu1 }
  0xec   :  { %v1123_v52 = vpop.f32.mrb[11].mxu0  ;;  %v455_v57 = vmul.f32 %v1426_v45, %v1426_v45  ;;  %v1439_v58 = vadd.f32 %v1394_v24, %v230_v48  ;;  %v401_v63 = vsel %vm393_vm3, %v1426_v45, 0.0  ;;  %v1155_v0 = vpop.f32.mrb[11].mxu1 }
  0xed   :  { %v402_v9 = vadd.f32 %v401_v63, %v400_v2  ;;  %v315_v0 = vshrl.u32 %v314_v49, 7 }
  0xee   :  { %v484_v4 = vsel %vm393_vm3, %v455_v57, 0.0  ;;  %v456_v5 = vmul.f32 %v1439_v58, %v1439_v58  ;;  %v403_v11 = vsel %vm393_vm3, %v1439_v58, 0.0 }
  0xef   :  { %v485_v15 = vadd.f32 %v484_v4, %v483_v8  ;;  %v404_v21 = vadd.f32 %v403_v11, %v402_v9 }
  0xf0   :  { %v486_v17 = vsel %vm393_vm3, %v456_v5, 0.0 }
  0xf1   :  { %v235_v3 = vpop.f32.mrb[12].mxu0  ;;  %v1459_v16 = vpop.f32.mrb[12].mxu1  ;;  %v487_v31 = vadd.f32 %v486_v17, %v485_v15  ;;  %v1502_v15 = vadd.s32 96, %v315_v0  ;;  %v1536_v0 = vadd.f32 %v1394_v24, %v1389_v22 }
  0xf2   :  { %v1450_v6 = vadd.f32 %v1394_v24, %v235_v3  ;;  %v1126_v7 = vpop.f32.mrb[13].mxu0  ;;  %v1158_v19 = vpop.f32.mrb[13].mxu1 }
  0xf3   :  { %v238_v10 = vpop.f32.mrb[14].mxu0  ;;  %v1464_v23 = vpop.f32.mrb[14].mxu1  ;;  %vm340_vm4 = vcmp.lt.s32.totalorder %v1502_v15, 100  ;;  %v1208_v15 = vld [vmem:[%s1876_s3] sm:$0xff]  }
  0xf4   :  { %v457_v12 = vmul.f32 %v1450_v6, %v1450_v6  ;;  %v1457_v13 = vadd.f32 %v1394_v24, %v238_v10  ;;  %v1127_v14 = vpop.f32.mrb[15].mxu0  ;;  %v405_v18 = vsel %vm393_vm3, %v1450_v6, 0.0  ;;  %v1159_v28 = vpop.f32.mrb[15].mxu1  ;;  %1165 = vmatpush3.bf16.msra.mxu1 %v1208_v15 }
  0xf5   :  { %v406_v33 = vadd.f32 %v405_v18, %v404_v21  ;;  %1166 = vmatprep.subr.bf16.mxu1 %v1246_v1 }
  0xf6   :  { %v488_v25 = vsel %vm393_vm3, %v457_v12, 0.0  ;;  %v458_v27 = vmul.f32 %v1457_v13, %v1457_v13  ;;  %v407_v36 = vsel %vm393_vm3, %v1457_v13, 0.0 }
  0xf7   :  { %v489_v40 = vadd.f32 %v488_v25, %v487_v31  ;;  %v408_v48 = vadd.f32 %v407_v36, %v406_v33 }
  0xf8   :  { %v490_v42 = vsel %vm393_vm3, %v458_v27, 0.0 }
  0xf9   :  { %v243_v34 = vpop.f32.mrb[16].mxu0  ;;  %v1482_v50 = vpop.f32.mrb[16].mxu1  ;;  %v491_v54 = vadd.f32 %v490_v42, %v489_v40 }
  0xfa   :  { %v1472_v37 = vadd.f32 %v1394_v24, %v243_v34  ;;  %v1130_v38 = vpop.f32.mrb[17].mxu0  ;;  %v1162_v53 = vpop.f32.mrb[17].mxu1 }
  0xfb   :  { %v246_v41 = vpop.f32.mrb[18].mxu0  ;;  %v1487_v57 = vpop.f32.mrb[18].mxu1 }
  0xfc   :  { %v409_v43 = vsel %vm393_vm3, %v1472_v37, 0.0  ;;  %v459_v44 = vmul.f32 %v1472_v37, %v1472_v37  ;;  %v1480_v46 = vadd.f32 %v1394_v24, %v246_v41  ;;  %v1131_v47 = vpop.f32.mrb[19].mxu0  ;;  %v1163_v60 = vpop.f32.mrb[19].mxu1 }
  0xfd   :  { %v410_v56 = vadd.f32 %v409_v43, %v408_v48 }
  0xfe   :  { %v492_v51 = vsel %vm393_vm3, %v459_v44, 0.0  ;;  %v460_v52 = vmul.f32 %v1480_v46, %v1480_v46  ;;  %v411_v59 = vsel %vm393_vm3, %v1480_v46, 0.0 }
  0xff   :  { %v493_v62 = vadd.f32 %v492_v51, %v491_v54  ;;  %v412_v5 = vadd.f32 %v411_v59, %v410_v56  ;;  %v1529_v54 = vadd.f32 %v1394_v24, %v1387_v20 }
 0x100   :  { %v494_v2 = vsel %vm393_vm3, %v460_v52, 0.0 }
 0x101   :  { %v251_v63 = vpop.f32.mrb[20].mxu0  ;;  %v495_v12 = vadd.f32 %v494_v2, %v493_v62 }
 0x102   :  { %v1493_v3 = vadd.f32 %v1394_v24, %v251_v63  ;;  %v1134_v4 = vpop.f32.mrb[21].mxu0 }
 0x103   :  { %v254_v7 = vpop.f32.mrb[22].mxu0 }
 0x104   :  { %v413_v8 = vsel %vm393_vm3, %v1493_v3, 0.0  ;;  %v461_v9 = vmul.f32 %v1493_v3, %v1493_v3  ;;  %v1500_v10 = vadd.f32 %v1394_v24, %v254_v7  ;;  %v1135_v11 = vpop.f32.mrb[23].mxu0  ;;  %v467_v7 = vmul.f32 %v1529_v54, %v1529_v54 }
 0x105   :  { %v414_v14 = vadd.f32 %v413_v8, %v412_v5 }
 0x106   :  { %v496_v17 = vsel %vm393_vm3, %v461_v9, 0.0  ;;  %v415_v18 = vsel %vm393_vm3, %v1500_v10, 0.0  ;;  %v462_v19 = vmul.f32 %v1500_v10, %v1500_v10  ;;  %v1549_v9 = vadd.f32 %v1394_v24, %v1405_v32 }
 0x107   :  { %v497_v21 = vadd.f32 %v496_v17, %v495_v12  ;;  %v416_v25 = vadd.f32 %v415_v18, %v414_v14  ;;  %v1558_v14 = vadd.f32 %v1394_v24, %v1409_v35  ;;  %v468_v32 = vmul.f32 %v1536_v0, %v1536_v0 }
 0x108   :  { %v498_v27 = vsel %vm393_vm3, %v462_v19, 0.0  ;;  %v425_v19 = vsel %vm393_vm3, %v1529_v54, 0.0  ;;  %v469_v35 = vmul.f32 %v1549_v9, %v1549_v9 }
 0x109   :  { %v499_v28 = vadd.f32 %v498_v27, %v497_v21  ;;  %v259_v31 = vpop.f32.mrb[24].mxu0 }
 0x10a   :  { %v1512_v33 = vadd.f32 %v1394_v24, %v259_v31  ;;  %v1138_v34 = vpop.f32.mrb[25].mxu0  ;;  %v427_v31 = vsel %vm393_vm3, %v1536_v0, 0.0 }
 0x10b   :  { %v262_v36 = vpop.f32.mrb[26].mxu0  ;;  %v1572_v34 = vadd.f32 %v1394_v24, %v1432_v55  ;;  %v431_v55 = vsel %vm393_vm3, %v1558_v14, 0.0 }
 0x10c   :  { %v379_v38 = vsel %vm340_vm4, %v1512_v33, 0.0  ;;  %v1518_v40 = vadd.f32 %v1394_v24, %v262_v36  ;;  %v1139_v41 = vpop.f32.mrb[27].mxu0  ;;  %v470_v36 = vmul.f32 %v1558_v14, %v1558_v14 }
 0x10d   :  { %v417_v42 = vsel %vm393_vm3, %v379_v38, 0.0  ;;  %v463_v43 = vmul.f32 %v379_v38, %v379_v38 }
 0x10e   :  { %v418_v44 = vadd.f32 %v417_v42, %v416_v25  ;;  %v419_v47 = vsel %vm393_vm3, %v1518_v40, 0.0  ;;  %v464_v48 = vmul.f32 %v1518_v40, %v1518_v40  ;;  %v510_v42 = vsel %vm393_vm3, %v468_v32, 0.0 }
 0x10f   :  { %v500_v49 = vsel %vm393_vm3, %v463_v43, 0.0  ;;  %v429_v43 = vsel %vm393_vm3, %v1549_v9, 0.0 }
 0x110   :  { %v501_v51 = vadd.f32 %v500_v49, %v499_v28  ;;  %v420_v52 = vadd.f32 %v419_v47, %v418_v44  ;;  %v502_v53 = vsel %vm393_vm3, %v464_v48, 0.0  ;;  %v508_v28 = vsel %vm393_vm3, %v467_v7, 0.0 }
 0x111   :  { %v267_v56 = vpop.f32.mrb[28].mxu0  ;;  %v1581_v44 = vadd.f32 %v1394_v24, %v1441_v61  ;;  %v512_v49 = vsel %vm393_vm3, %v469_v35, 0.0  ;;  %v433_v61 = vsel %vm393_vm3, %v1572_v34, 0.0 }
 0x112   :  { %v503_v59 = vadd.f32 %v502_v53, %v501_v51  ;;  %v1532_v60 = vadd.f32 %v1394_v24, %v267_v56  ;;  %v1142_v62 = vpop.f32.mrb[29].mxu0  ;;  %v471_v51 = vmul.f32 %v1572_v34, %v1572_v34  ;;  %v514_v53 = vsel %vm393_vm3, %v470_v36, 0.0 }
 0x113   :  { %v270_v63 = vpop.f32.mrb[30].mxu0  ;;  %v472_v62 = vmul.f32 %v1581_v44, %v1581_v44 }
 0x114   :  { %v421_v2 = vsel %vm393_vm3, %v1532_v60, 0.0  ;;  %v465_v4 = vmul.f32 %v1532_v60, %v1532_v60  ;;  %v1543_v20 = vadd.f32 %v1394_v24, %v270_v63  ;;  %v1143_v5 = vpop.f32.mrb[31].mxu0  ;;  %v1599_v63 = vadd.f32 %v1394_v24, %v1464_v23 }
 0x115   :  { %v422_v8 = vadd.f32 %v421_v2, %v420_v52  ;;  %v1590_v52 = vadd.f32 %v1394_v24, %v1459_v16  ;;  %v1603_v2 = vadd.f32 %v1394_v24, %v1482_v50  ;;  %v1607_v5 = vadd.f32 %v1394_v24, %v1487_v57 }
 0x116   :  { %v504_v22 = vsel %vm393_vm3, %v465_v4, 0.0  ;;  %v423_v11 = vsel %vm393_vm3, %v1543_v20, 0.0  ;;  %v466_v12 = vmul.f32 %v1543_v20, %v1543_v20  ;;  %v516_v7 = vsel %vm393_vm3, %v471_v51, 0.0 }
 0x117   :  { %v505_v17 = vadd.f32 %v504_v22, %v503_v59  ;;  %v424_v18 = vadd.f32 %v423_v11, %v422_v8  ;;  %v435_v8 = vsel %vm393_vm3, %v1581_v44, 0.0  ;;  %v473_v22 = vmul.f32 %v1590_v52, %v1590_v52 }
 0x118   :  { %v506_v21 = vsel %vm393_vm3, %v466_v12, 0.0  ;;  %v518_v12 = vsel %vm393_vm3, %v472_v62, 0.0  ;;  %v437_v50 = vsel %vm393_vm3, %v1590_v52, 0.0  ;;  %v475_v24 = vmul.f32 %v1603_v2, %v1603_v2 }
 0x119   :  { %v426_v25 = vadd.f32 %v425_v19, %v424_v18  ;;  %v507_v27 = vadd.f32 %v506_v21, %v505_v17  ;;  %v474_v17 = vmul.f32 %v1599_v63, %v1599_v63  ;;  %v392_v19 = vsel %vm340_vm4, %v1607_v5, 0.0 }
 0x11a   :  { %v520_v32 = vsel %vm393_vm3, %v473_v22, 0.0  ;;  %v439_v21 = vsel %vm393_vm3, %v1599_v63, 0.0  ;;  %v524_v35 = vsel %vm393_vm3, %v475_v24, 0.0  ;;  %v476_v36 = vmul.f32 %v392_v19, %v392_v19 }
 0x11b   :  { %v428_v38 = vadd.f32 %v427_v31, %v426_v25  ;;  %v509_v41 = vadd.f32 %v508_v28, %v507_v27  ;;  %v441_v25 = vsel %vm393_vm3, %v1603_v2, 0.0  ;;  %v522_v31 = vsel %vm393_vm3, %v474_v17, 0.0 }
 0x11d   :  { %v511_v47 = vadd.f32 %v510_v42, %v509_v41  ;;  %v430_v48 = vadd.f32 %v429_v43, %v428_v38  ;;  %v443_v42 = vsel %vm393_vm3, %v392_v19, 0.0 }
 0x11f   :  { %v432_v56 = vadd.f32 %v431_v55, %v430_v48  ;;  %v513_v59 = vadd.f32 %v512_v49, %v511_v47  ;;  %v526_v48 = vsel %vm393_vm3, %v476_v36, 0.0 }
 0x121   :  { %v434_v16 = vadd.f32 %v433_v61, %v432_v56  ;;  %v515_v4 = vadd.f32 %v514_v53, %v513_v59 }
 0x123   :  { %v436_v23 = vadd.f32 %v435_v8, %v434_v16  ;;  %v517_v11 = vadd.f32 %v516_v7, %v515_v4 }
 0x125   :  { %v519_v57 = vadd.f32 %v518_v12, %v517_v11  ;;  %v438_v18 = vadd.f32 %v437_v50, %v436_v23 }
 0x127   :  { %v521_v27 = vadd.f32 %v520_v32, %v519_v57  ;;  %v440_v28 = vadd.f32 %v439_v21, %v438_v18 }
 0x129   :  { %v523_v38 = vadd.f32 %v522_v31, %v521_v27  ;;  %v442_v41 = vadd.f32 %v441_v25, %v440_v28 }
 0x12b   :  { %v525_v43 = vadd.f32 %v524_v35, %v523_v38  ;;  %v444_v47 = vadd.f32 %v443_v42, %v442_v41 }
 0x12d   :  { %v445_v49 = vrot.slane %v444_v47, 4  ;;  %v527_v55 = vadd.f32 %v526_v48, %v525_v43 }
 0x12f   :  { %v446_v51 = vadd.f32 %v445_v49, %v444_v47  ;;  %v528_v53 = vrot.slane %v527_v55, 4 }
 0x131   :  { %v447_v56 = vrot.slane %v446_v51, 2  ;;  %v529_v59 = vadd.f32 %v528_v53, %v527_v55 }
 0x133   :  { %v448_v61 = vadd.f32 %v447_v56, %v446_v51  ;;  %v530_v62 = vrot.slane %v529_v59, 2 }
 0x135   :  { %v449_v16 = vrot.slane %v448_v61, 1  ;;  %v531_v4 = vadd.f32 %v530_v62, %v529_v59 }
 0x137   :  { %v450_v7 = vadd.f32 %v449_v16, %v448_v61  ;;  %v532_v8 = vrot.slane %v531_v4, 1 }
 0x139   :  { %v533_v22 = vadd.f32 %v532_v8, %v531_v4  ;;  %v1633_v23 = vmul.f32 0.005, %v450_v7 }
 0x13b   :  { %v535_v11 = vmul.f32 0.005, %v533_v22  ;;  %v536_v12 = vmul.f32 %v1633_v23, %v1633_v23  ;;  %v552_v50 = vsub.f32 %v1518_v40, %v1633_v23  ;;  %v553_v17 = vsub.f32 %v1532_v60, %v1633_v23 }
 0x13c   :  { %v554_v24 = vsub.f32 %v1543_v20, %v1633_v23  ;;  %v555_v57 = vsub.f32 %v1529_v54, %v1633_v23  ;;  %v556_v18 = vsub.f32 %v1536_v0, %v1633_v23  ;;  %v557_v19 = vsub.f32 %v1549_v9, %v1633_v23 }
 0x13d   :  { %v537_v32 = vsub.f32 %v535_v11, %v536_v12  ;;  %v558_v21 = vsub.f32 %v1558_v14, %v1633_v23  ;;  %v559_v40 = vsub.f32 %v1572_v34, %v1633_v23  ;;  %v560_v60 = vsub.f32 %v1581_v44, %v1633_v23 }
 0x13e   :  { %v561_v20 = vsub.f32 %v1590_v52, %v1633_v23  ;;  %v562_v54 = vsub.f32 %v1599_v63, %v1633_v23  ;;  %v563_v0 = vsub.f32 %v1603_v2, %v1633_v23  ;;  %v564_v9 = vsub.f32 %v1607_v5, %v1633_v23 }
 0x13f   :  { %v538_v25 = vmax.f32 %v537_v32, 0.0  ;;  %v549_v34 = vsub.f32 %v1493_v3, %v1633_v23  ;;  %v550_v44 = vsub.f32 %v1500_v10, %v1633_v23  ;;  %v551_v52 = vsub.f32 %v1512_v33, %v1633_v23 }
 0x140   :  { %v539_v63 = vsub.f32 %v1400_v29, %v1633_v23  ;;  %v540_v2 = vsub.f32 %v1397_v26, %v1633_v23  ;;  %v541_v5 = vsub.f32 %v1403_v30, %v1633_v23  ;;  %v542_v28 = vsub.f32 %v1418_v39, %v1633_v23 }
 0x141   :  { %v565_v14 = vadd.f32 1e-05, %v538_v25  ;;  %v543_v51 = vsub.f32 %v1426_v45, %v1633_v23  ;;  %v544_v56 = vsub.f32 %v1439_v58, %v1633_v23  ;;  %v545_v59 = vsub.f32 %v1450_v6, %v1633_v23 }
 0x142   :  { %v546_v61 = vsub.f32 %v1457_v13, %v1633_v23  ;;  %v547_v4 = vsub.f32 %v1472_v37, %v1633_v23  ;;  %v548_v45 = vsub.f32 %v1480_v46, %v1633_v23 }
 0x143   :  { %1214 = vrsqrt.f32 %v565_v14 }
 0x14d   :  { %v1669_v27 = vpop.eup %1214 }
 0x14e   :  { %v580_v31 = vmul.f32 %v1669_v27, %v552_v50  ;;  %v581_v35 = vmul.f32 %v1669_v27, %v553_v17  ;;  %v582_v36 = vmul.f32 %v1669_v27, %v554_v24  ;;  %v583_v38 = vmul.f32 %v1669_v27, %v555_v57 }
 0x14f   :  { %v584_v41 = vmul.f32 %v1669_v27, %v556_v18  ;;  %v585_v29 = vmul.f32 %v1669_v27, %v557_v19  ;;  %v586_v26 = vmul.f32 %v1669_v27, %v558_v21  ;;  %v587_v42 = vmul.f32 %v1669_v27, %v559_v40 }
 0x150   :  { %v588_v30 = vmul.f32 %v1669_v27, %v560_v60  ;;  %v1689_v39 = vmul.f32 %v1669_v27, %v561_v20  ;;  %v1692_v43 = vmul.f32 %v1669_v27, %v562_v54  ;;  %v1695_v47 = vmul.f32 %v1669_v27, %v563_v0 }
 0x151   :  { %v1698_v48 = vmul.f32 %v1669_v27, %v564_v9  ;;  %v650_v49 = vsel %vm393_vm3, %v580_v31, 0.0  ;;  %v651_v55 = vsel %vm393_vm3, %v581_v35, 0.0  ;;  %v653_v62 = vsel %vm393_vm3, %v582_v36, 0.0 }
 0x152   :  { %v652_v53 = vadd.f32 %v651_v55, %v650_v49  ;;  %v655_v16 = vsel %vm393_vm3, %v583_v38, 0.0  ;;  %v657_v8 = vsel %vm393_vm3, %v584_v41, 0.0  ;;  %v659_v58 = vsel %vm393_vm3, %v585_v29, 0.0 }
 0x153   :  { %v661_v6 = vsel %vm393_vm3, %v586_v26, 0.0  ;;  %v663_v22 = vsel %vm393_vm3, %v587_v42, 0.0  ;;  %v665_v13 = vsel %vm393_vm3, %v588_v30, 0.0  ;;  %v738_v11 = vsel %vm393_vm3, %v580_v31, -inf }
 0x154   :  { %v654_v7 = vadd.f32 %v653_v62, %v652_v53  ;;  %v739_v12 = vsel %vm393_vm3, %v581_v35, -inf  ;;  %v706_v37 = vsel %vm340_vm4, %v1698_v48, -3e+38  ;;  %v740_v46 = vsel %vm393_vm3, %v582_v36, -inf }
 0x155   :  { %v742_v17 = vsel %vm393_vm3, %v583_v38, -inf  ;;  %v741_v24 = vmax.f32 %v738_v11, %v740_v46  ;;  %v744_v18 = vsel %vm393_vm3, %v584_v41, -inf  ;;  %v746_v19 = vsel %vm393_vm3, %v585_v29, -inf }
 0x156   :  { %v656_v50 = vadd.f32 %v655_v16, %v654_v7  ;;  %v743_v57 = vmax.f32 %v739_v12, %v742_v17  ;;  %v748_v21 = vsel %vm393_vm3, %v586_v26, -inf  ;;  %v750_v40 = vsel %vm393_vm3, %v587_v42, -inf }
 0x157   :  { %v752_v60 = vsel %vm393_vm3, %v588_v30, -inf  ;;  %v745_v20 = vmax.f32 %v741_v24, %v744_v18  ;;  %v754_v0 = vsel %vm393_vm3, %v1689_v39, -inf  ;;  %v756_v9 = vsel %vm393_vm3, %v1692_v43, -inf }
 0x158   :  { %v658_v32 = vadd.f32 %v657_v8, %v656_v50  ;;  %v747_v54 = vmax.f32 %v743_v57, %v746_v19  ;;  %v758_v14 = vsel %vm393_vm3, %v1695_v47, -inf  ;;  %v567_v31 = vmul.f32 %v1669_v27, %v539_v63 }
 0x159   :  { %v568_v35 = vmul.f32 %v1669_v27, %v540_v2  ;;  %v749_v36 = vmax.f32 %v745_v20, %v748_v21  ;;  %v569_v41 = vmul.f32 %v1669_v27, %v541_v5  ;;  %v570_v29 = vmul.f32 %v1669_v27, %v542_v28 }
 0x15a   :  { %v660_v25 = vadd.f32 %v659_v58, %v658_v32  ;;  %v751_v38 = vmax.f32 %v747_v54, %v750_v40  ;;  %v571_v42 = vmul.f32 %v1669_v27, %v543_v51  ;;  %v572_v30 = vmul.f32 %v1669_v27, %v544_v56 }
 0x15b   :  { %v573_v49 = vmul.f32 %v1669_v27, %v545_v59  ;;  %v753_v55 = vmax.f32 %v749_v36, %v752_v60  ;;  %v574_v62 = vmul.f32 %v1669_v27, %v546_v61  ;;  %v575_v63 = vmul.f32 %v1669_v27, %v547_v4 }
 0x15c   :  { %v662_v26 = vadd.f32 %v661_v6, %v660_v25  ;;  %v755_v53 = vmax.f32 %v751_v38, %v754_v0  ;;  %v1749_v16 = vmul.f32 %v1669_v27, %v548_v45  ;;  %v1755_v5 = vmul.f32 %v1669_v27, %v549_v34 }
 0x15d   :  { %v1761_v28 = vmul.f32 %v1669_v27, %v550_v44  ;;  %v757_v51 = vmax.f32 %v753_v55, %v756_v9  ;;  %v1767_v59 = vmul.f32 %v1669_v27, %v551_v52  ;;  %v619_v61 = vsel %vm393_vm3, %v567_v31, 0.0 }
 0x15e   :  { %v664_v2 = vadd.f32 %v663_v22, %v662_v26  ;;  %v759_v56 = vmax.f32 %v755_v53, %v758_v14  ;;  %v760_v34 = vsel %vm393_vm3, %v706_v37, -inf  ;;  %v620_v4 = vsel %vm393_vm3, %v568_v35, 0.0 }
 0x15f   :  { %v667_v10 = vsel %vm393_vm3, %v1689_v39, 0.0  ;;  %v761_v44 = vmax.f32 %v757_v51, %v760_v34  ;;  %v621_v45 = vadd.f32 %v620_v4, %v619_v61  ;;  %v622_v8 = vsel %vm393_vm3, %v569_v41, 0.0 }
 0x160   :  { %v666_v3 = vadd.f32 %v665_v13, %v664_v2  ;;  %v669_v33 = vsel %vm393_vm3, %v1692_v43, 0.0  ;;  %v618_v27 = vsel %vm340_vm4, %v1698_v48, 0.0  ;;  %v624_v6 = vsel %vm393_vm3, %v570_v29, 0.0 }
 0x161   :  { %v762_v23 = vmax.f32 %v761_v44, %v759_v56  ;;  %v623_v52 = vadd.f32 %v622_v8, %v621_v45  ;;  %v671_v39 = vsel %vm393_vm3, %v1695_v47, 0.0  ;;  %v707_v13 = vsel %vm393_vm3, %v567_v31, -inf }
 0x162   :  { %v668_v7 = vadd.f32 %v667_v10, %v666_v3  ;;  %v708_v11 = vsel %vm393_vm3, %v568_v35, -inf  ;;  %v626_v43 = vsel %vm393_vm3, %v571_v42, 0.0  ;;  %v709_v50 = vsel %vm393_vm3, %v569_v41, -inf }
 0x163   :  { %v625_v22 = vadd.f32 %v624_v6, %v623_v52  ;;  %v711_v37 = vsel %vm393_vm3, %v570_v29, -inf  ;;  %v673_v48 = vsel %vm393_vm3, %v618_v27, 0.0  ;;  %v710_v17 = vmax.f32 %v707_v13, %v709_v50 }
 0x164   :  { %v670_v58 = vadd.f32 %v669_v33, %v668_v7  ;;  %v712_v24 = vmax.f32 %v708_v11, %v711_v37  ;;  %v628_v47 = vsel %vm393_vm3, %v572_v30, 0.0  ;;  %v713_v18 = vsel %vm393_vm3, %v571_v42, -inf }
 0x165   :  { %v627_v46 = vadd.f32 %v626_v43, %v625_v22  ;;  %v715_v19 = vsel %vm393_vm3, %v572_v30, -inf  ;;  %v714_v21 = vmax.f32 %v710_v17, %v713_v18  ;;  %v630_v20 = vsel %vm393_vm3, %v573_v49, 0.0 }
 0x166   :  { %v672_v12 = vadd.f32 %v671_v39, %v670_v58  ;;  %v716_v40 = vmax.f32 %v712_v24, %v715_v19  ;;  %v717_v54 = vsel %vm393_vm3, %v573_v49, -inf  ;;  %v719_v0 = vsel %vm393_vm3, %v574_v62, -inf }
 0x167   :  { %v629_v32 = vadd.f32 %v628_v47, %v627_v46  ;;  %v718_v25 = vmax.f32 %v714_v21, %v717_v54  ;;  %v763_v31 = vrot.slane %v762_v23, 4  ;;  %v632_v35 = vsel %vm393_vm3, %v574_v62, 0.0  ;;  %v1209_v21 = vld [vmem:[%s1876_s3 + $0x8] sm:$0xff]  }
 0x168   :  { %v674_v57 = vadd.f32 %v673_v48, %v672_v12  ;;  %v720_v14 = vmax.f32 %v716_v40, %v719_v0  ;;  %v693_v36 = vsel %vm340_vm4, %v1767_v59, -3e+38  ;;  %v721_v38 = vsel %vm393_vm3, %v575_v63, -inf  ;;  %1167 = vmatpush3.bf16.msra.mxu1 %v1209_v21  ;;  %v1210_v40 = vld [vmem:[%s1876_s3 + $0x10] sm:$0xff]  }
 0x169   :  { %v631_v9 = vadd.f32 %v630_v20, %v629_v32  ;;  %v723_v41 = vsel %vm393_vm3, %v1749_v16, -inf  ;;  %v722_v26 = vmax.f32 %v718_v25, %v721_v38  ;;  %v764_v30 = vmax.f32 %v762_v23, %v763_v31  ;;  %1168 = vmatprep.subr.bf16.mxu1 %v1246_v1 }
 0x16a   :  { %v675_v60 = vrot.slane %v674_v57, 4  ;;  %v724_v42 = vmax.f32 %v720_v14, %v723_v41  ;;  %v634_v49 = vsel %vm393_vm3, %v575_v63, 0.0  ;;  %v725_v55 = vsel %vm393_vm3, %v1755_v5, -inf }
 0x16b   :  { %v633_v29 = vadd.f32 %v632_v35, %v631_v9  ;;  %v727_v53 = vsel %vm393_vm3, %v1761_v28, -inf  ;;  %v726_v51 = vmax.f32 %v722_v26, %v725_v55  ;;  %v636_v61 = vsel %vm393_vm3, %v1749_v16, 0.0 }
 0x16c   :  { %v676_v2 = vadd.f32 %v675_v60, %v674_v57  ;;  %v728_v56 = vmax.f32 %v724_v42, %v727_v53  ;;  %v729_v3 = vsel %vm393_vm3, %v693_v36, -inf  ;;  %v765_v10 = vrot.slane %v764_v30, 2  ;;  %1169 = vmatpush3.bf16.msra.mxu1 %v1210_v40 }
 0x16d   :  { %v635_v62 = vadd.f32 %v634_v49, %v633_v29  ;;  %v730_v4 = vmax.f32 %v726_v51, %v729_v3  ;;  %v638_v63 = vsel %vm393_vm3, %v1755_v5, 0.0  ;;  %v605_v44 = vsel %vm340_vm4, %v1767_v59, 0.0  ;;  %1174 = vmatprep.subr.bf16.mxu1 %v1246_v1 }
 0x16e   :  { %v677_v7 = vrot.slane %v676_v2, 2  ;;  %v640_v33 = vsel %vm393_vm3, %v1761_v28, 0.0  ;;  %v766_v52 = vmax.f32 %v764_v30, %v765_v10  ;;  %v642_v27 = vsel %vm393_vm3, %v605_v44, 0.0 }
 0x16f   :  { %v637_v34 = vadd.f32 %v636_v61, %v635_v62  ;;  %v731_v8 = vmax.f32 %v730_v4, %v728_v56 }
 0x170   :  { %v678_v6 = vadd.f32 %v677_v7, %v676_v2  ;;  %v767_v13 = vrot.slane %v766_v52, 1  ;;  %v1075_v7 = vld [vmem:[%s1877_s4] ss:$0 sm:$0xff] }
 0x171   :  { %v639_v45 = vadd.f32 %v638_v63, %v637_v34  ;;  %v732_v16 = vrot.slane %v731_v8, 4  ;;  %v1211_v63 = vld [vmem:[%s1878_s5] sm:$0xff]  }
 0x172   :  { %v679_v11 = vrot.slane %v678_v6, 1  ;;  %v768_v50 = vmax.f32 %v766_v52, %v767_v13 }
 0x173   :  { %v641_v23 = vadd.f32 %v640_v33, %v639_v45  ;;  %v733_v39 = vmax.f32 %v731_v8, %v732_v16  ;;  %v1212_v45 = vld [vmem:[%s1878_s5 + $0x8] sm:$0xff]  }
 0x174   :  { %v680_v48 = vadd.f32 %v679_v11, %v678_v6 }
 0x175   :  { %v643_v58 = vadd.f32 %v642_v27, %v641_v23  ;;  %v734_v5 = vrot.slane %v733_v39, 2 }
 0x176   :  { %v770_v47 = vmul.f32 0.01, %v680_v48 }
 0x177   :  { %v644_v22 = vrot.slane %v643_v58, 4  ;;  %v735_v12 = vmax.f32 %v733_v39, %v734_v5  ;;  %v1080_v39 = vld [vmem:[%s1879_s6] ss:$0 sm:$0xff]  ;;  %s1250_s6 = smov [#allocation2]  }
 0x179   :  { %v645_v59 = vadd.f32 %v644_v22, %v643_v58  ;;  %v736_v43 = vrot.slane %v735_v12, 1  ;;  %v1213_v58 = vld [vmem:[%s1880_s7] sm:$0xff]  }
 0x17b   :  { %v646_v28 = vrot.slane %v645_v59, 2  ;;  %v737_v46 = vmax.f32 %v735_v12, %v736_v43 }
 0x17d   :  { %v647_v37 = vadd.f32 %v646_v28, %v645_v59  ;;  %v784_v24 = vsel %vm773_vm5, %v768_v50, %v737_v46  ;;  %v1084_v28 = vld [vmem:[%s1881_s8] ss:$0 sm:$0xff]  ;;  %s1040_s8 = sshll.u32 %s1250_s6, 4  ;;  %s1041_s8 = int_to_ptr.vmem [resolvable:$true] %s1040_s8 }
 0x17e   :  { %s1222_s30 = scalar_lea.vmem %s1041_s8, 32  ;;  %p1227_p1 = scmp.lt.s32.totalorder %s1041_s8, %s1041_s8 }
 0x17f   :  { %v648_v17 = vrot.slane %v647_v37, 1  ;;  %p1223_p0 = scmp.ne.s32.totalorder %s1041_s8, %s1222_s30  ;;  %p1228_p2 = scmp.lt.s32.totalorder %s1222_s30, %s1222_s30 }
 0x181   :  { %v649_v57 = vadd.f32 %v648_v17, %v647_v37  ;;  %p1229_p3 = por %p1228_p2, %p1227_p1 }
 0x183   :  { %v778_v18 = vsel %vm773_vm5, %v680_v48, %v649_v57  ;;  %v769_v19 = vmul.f32 0.01, %v649_v57  ;;  %p1230_p4 = pnand %p1229_p3, %p1223_p0 }
 0x184   :  { %779 = vrot.lane.b32.xlu0 %v778_v18, %s1248_s16 }
 0x185   :  { %v774_v32 = vsel %vm773_vm5, %v770_v47, %v769_v19 }
 0x188   :  { %785 = vrot.lane.b32.xlu0 %v784_v24, %s1249_s17 }
 0x1f6   :  { %v780_v60 = vpop.permute.xlu0 %779 }
 0x1f7   :  { %v788_v20 = vsel %vm393_vm3, %v774_v32, %v780_v60 }
 0x1fa   :  { %v786_v54 = vpop.permute.xlu0 %785 }
 0x1fb   :  { %v790_v0 = vsel %vm789_vm6, %v788_v20, %v786_v54 }
 0x1fc   :  { %v792_v9 = vsel %vm791_vm7, %v790_v0, 0.0  ;;  %v799_v25 = vmul.f32 %v790_v0, %v790_v0 }
 0x1fd   :  { %v793_v14 = vrot.slane %v792_v9, 4 }
 0x1fe   :  { %v800_v31 = vsel %vm791_vm7, %v799_v25, 0.0 }
 0x1ff   :  { %v794_v35 = vadd.f32 %v793_v14, %v792_v9  ;;  %v801_v36 = vrot.slane %v800_v31, 4 }
 0x201   :  { %v795_v38 = vrot.slane %v794_v35, 2  ;;  %v802_v41 = vadd.f32 %v801_v36, %v800_v31 }
 0x203   :  { %v796_v29 = vadd.f32 %v795_v38, %v794_v35  ;;  %v803_v26 = vrot.slane %v802_v41, 2 }
 0x205   :  { %v797_v42 = vrot.slane %v796_v29, 1  ;;  %v804_v30 = vadd.f32 %v803_v26, %v802_v41 }
 0x207   :  { %v798_v49 = vadd.f32 %v797_v42, %v796_v29  ;;  %v805_v55 = vrot.slane %v804_v30, 1 }
 0x209   :  { %v806_v53 = vadd.f32 %v805_v55, %v804_v30  ;;  %v807_v62 = vmul.f32 0.5, %v798_v49 }
 0x20b   :  { %v808_v2 = vmul.f32 0.5, %v806_v53  ;;  %v809_v51 = vmul.f32 %v807_v62, %v807_v62  ;;  %v812_v34 = vsub.f32 %v790_v0, %v807_v62 }
 0x20d   :  { %v810_v56 = vsub.f32 %v808_v2, %v809_v51 }
 0x20f   :  { %v811_v61 = vmax.f32 %v810_v56, 0.0 }
 0x211   :  { %v813_v3 = vadd.f32 1e-05, %v811_v61 }
 0x213   :  { %1216 = vrsqrt.f32 %v813_v3 }
 0x21d   :  { %v1217_v4 = vpop.eup %1216 }
 0x21e   :  { %v815_v10 = vmul.f32 %v1217_v4, %v812_v34 }
 0x220   :  { %v816_v44 = vpack.c.bf16 %v815_v10, %v815_v10 }
 0x222   :  { %1171 = vmatmul.mubr.msk.bf16.vlgmr.msra.gmra.mrb[20].mxu1 %vm848_vm8, %v816_v44 }
 0x223   :  { %1175 = vmatpush3.bf16.msra.mxu1 %v1211_v63  ;;  %1178 = vmatprep.mubr.msk.bf16.mxu1 %vm1247_vm1, %v1246_v1 }
 0x224   :  { %1176 = vmatprep.subr.bf16.mxu1 %v1246_v1 }
 0x227   :  { %1177 = vmatpush3.bf16.msra.mxu1 %v1212_v45 }
 0x228   :  { %1182 = vmatprep.subr.bf16.mxu1 %v1246_v1 }
 0x2f5   :  { %v886_v8 = vpop.f32.mrb[20].mxu1 }
 0x2f6   :  { %v887_v33 = vadd.f32 %v1075_v7, %v886_v8  ;;  %v1172_v23 = vpop.f32.mrb[21].mxu1 }
 0x2f7   :  { %v889_v16 = vpop.f32.mrb[22].mxu1 }
 0x2f8   :  { %v892_v52 = vmax.f32 %v887_v33, 0.0  ;;  %v1173_v27 = vpop.f32.mrb[23].mxu1 }
 0x2fa   :  { %v893_v6 = vpack.c.bf16 %v892_v52, %v892_v52 }
 0x2fc   :  { %1179 = vmatmul.mubr.msk.bf16.vlgmr.msra.gmra.mrb[24].mxu1 %vm789_vm6, %v893_v6 }
 0x2fd   :  { %1183 = vmatpush3.bf16.msra.mxu1 %v1213_v58  ;;  %1184 = vmatprep.mubr.msk.bf16.mxu1 %vm1247_vm1, %v1246_v1 }
 0x3cf   :  { %v954_v22 = vpop.f32.mrb[24].mxu1 }
 0x3d0   :  { %v955_v5 = vadd.f32 %v1080_v39, %v954_v22  ;;  %v1180_v13 = vpop.f32.mrb[25].mxu1 }
 0x3d1   :  { %v957_v15 = vpop.f32.mrb[26].mxu1 }
 0x3d2   :  { %v960_v59 = vmax.f32 %v955_v5, 0.0  ;;  %v1181_v11 = vpop.f32.mrb[27].mxu1 }
 0x3d4   :  { %v961_v12 = vpack.c.bf16 %v960_v59, %v960_v59 }
 0x3d6   :  { %1185 = vmatmul.mubr.msk.bf16.vlgmr.msra.gmra.mrb[28].mxu1 %vm393_vm3, %v961_v12 }
 0x4a9   :  { %v1014_v43 = vpop.f32.mrb[28].mxu1 }
 0x4aa   :  { %v1015_v1 = vadd.f32 %v1084_v28, %v1014_v43  ;;  %v1186_v50 = vpop.f32.mrb[29].mxu1 }
 0x4ab   :  { %v1017_v37 = vpop.f32.mrb[30].mxu1 }
 0x4ac   :  { %v1187_v48 = vpop.f32.mrb[31].mxu1  ;;  %v1021_v46 = vsel %vm1020_vm9, %v1015_v1, -inf }
 0x4ad   :  { %1022 = vmax.xlane.f32.xlu1 %v1021_v46 }
 0x53a   :  { %v1023_v17 = vpop.xlane.xlu1 %1022 }
 0x53b   :  { %v1024_v24 = vsub.f32 %v1015_v1, %v1023_v17 }
 0x53d   :  { %v1025_v57 = vmul.f32 1.442695, %v1024_v24 }
 0x53f   :  { %1218 = vpow2.f32 %v1025_v57 }
 0x549   :  { %v1219_v47 = vpop.eup %1218 }
 0x54a   :  { %v1027_v18 = vsel %vm1020_vm9, %v1219_v47, 0.0 }
 0x54b   :  { %1028 = vadd.xlane.f32.xlu1 %v1027_v18 }
 0x5d8   :  { %v1029_v19 = vpop.xlane.xlu1 %1028 }
 0x5d9   :  { %1220 = vlog2.f32 %v1029_v19 }
 0x5e3   :  { %v1221_v32 = vpop.eup %1220 }
 0x5e4   :  { %v1031_v21 = vmul.f32 0.6931472, %v1221_v32 }
 0x5e6   :  { %v1032_v40 = vsub.f32 %v1024_v24, %v1031_v21 }
 0x5e8   :  { %1033 = vst.msk [vmem:[#allocation2] sm:$0x3] %vm1020_vm9, %v1032_v40 }
 0x5e9   :  { %1233 = shalt.err (!%p1230_p4)
}
 0x5ea   :  { %s1234_s12 = scalar_lea.hbm %s1882_s9, 32 }
 0x5eb   :  { %p1235_p5 = scmp.ne.s32.totalorder %s1882_s9, %s1234_s12  ;;  %p1238_p6 = scmp.lt.u32.totalorder %s1234_s12, %s1882_s9 }
 0x5ed   :  { %p1240_p7 = pnand %p1238_p6, %p1235_p5 }
 0x5ef   :  { %1243 = shalt.err (!%p1240_p7)
}
 0x5f0   :  { %1043 = dma.vmem_to_hbm [thread:$0]  %s1041_s8, 32, %s1882_s9, [#allocation3]  }
 0x5f1   :  { %1244 = dma.done.wait [#allocation3], 32  }
 0x5f2   :  { %1245 = vsyncadd [#allocation3], 4294967264 }
 0x5f3   :  { %1047 = vsyncpa [#allocation3], 1 }

</bundles_post_ra>
